<compile_context>
chip_gen: v6e
topology: v6e:2x2x1
jax: 0.10.0
libtpu: 0.0.40
codegen_flags: <defaults>
</compile_context>

<pallas_src>
import numpy as np
import jax
import jax.numpy as jnp
from jax.experimental import pallas as pl
from jax.experimental.pallas import tpu as pltpu


def _community_loss_kernel(emb_ref, pi_ref, icov_ref, mu_a_ref, cen_ref,
                           const_ref, grp_ref, out_ref, acc_ref):
    """Accumulate sum_i sum_k logpdf(emb_i; k) * pi[i, k] over batch tiles.

    Grid is (core_split, batch_tile) with the first axis "parallel" (megacore)
    and the second "arbitrary" (reduction).

    emb_ref:   (D, TB)     batch-tile of node embeddings, batch on lanes (f32)
    pi_ref:    (K, TB)     batch-tile of mixture responsibilities       (f32)
    icov_ref:  (K*D, D)    [A_0; A_1; ...; A_{K-1}] stacked along sublanes
                           (bf16 or f32 -> selects MXU operand dtype)
    mu_a_ref:  (K*D, 1)    (mu_k^T A_k) flattened with the same (k, e) order (f32)
    cen_ref:   (K*D, 1)    mu_k flattened with the same (k, e) order        (f32)
    const_ref: (K, 1)      -0.5 * (D*log(2*pi) + logdet(Sigma_k))           (f32)
    grp_ref:   (K, K*D)    group-sum indicator (sums D sublanes per component)
    out_ref:   (1, 1, 1)   per-core partial SUM (abs is applied outside)
    acc_ref:   (K, TB)     VMEM scratch accumulator (per core, across batch tiles)
    """
    j = pl.program_id(1)

    @pl.when(j == 0)
    def _():
        acc_ref[...] = jnp.zeros_like(acc_ref)

    emb = emb_ref[...]                                     # (D, TB) f32
    icov = icov_ref[...]                                   # (K*D, D) bf16/f32
    k = const_ref.shape[0]
    mxu_dtype = icov.dtype

    # One lane-dense MXU matmul: tmp[k*D+e, b] = (A_k @ emb_b)[e]
    tmp = jnp.dot(icov, emb.astype(mxu_dtype),
                  preferred_element_type=jnp.float32)      # (K*D, TB)

    # Replicate emb along sublanes for the K component groups (cheap sublane tile;
    # fine at small K -- restructure the algebra if K grows large).
    emb_rep = jnp.concatenate([emb] * k, axis=0)           # (K*D, TB)

    # (A_k e - A_k mu_k) * (e - mu_k); summing over D gives (e-mu)^T A_k (e-mu)
    # exactly (diff form -> no catastrophic cancellation).
    prod = (tmp - mu_a_ref[...]) * (emb_rep - cen_ref[...])   # (K*D, TB) f32

    # Per-component Mahalanobis quadratic form via a tiny-M lane-dense matmul.
    quad = jnp.dot(grp_ref[...], prod.astype(mxu_dtype),
                   preferred_element_type=jnp.float32)     # (K, TB)

    logpdf = const_ref[...] - 0.5 * quad                   # (K, TB)

    # Wide element-wise accumulation: no cross-lane reduce in the hot loop.
    acc_ref[...] = acc_ref[...] + logpdf * pi_ref[...]

    @pl.when(j == pl.num_programs(1) - 1)
    def _():
        # Single cross-lane/sublane reduce, once per core.
        out_ref[...] = jnp.sum(acc_ref[...], keepdims=True).reshape(1, 1, 1)


def precompute_gmm_constants(centroid, covariance_mat, *, mxu_dtype=jnp.bfloat16):
    """Static per-GMM-fit constants. Cache the result outside the training step."""
    cen = centroid.astype(jnp.float32)                     # (K, D)
    cov = covariance_mat.astype(jnp.float32)               # (K, D, D)
    K, D = cen.shape

    L = jnp.linalg.cholesky(cov)                                           # (K, D, D)
    eye = jnp.eye(D, dtype=jnp.float32)
    inv_cov = jax.vmap(
        lambda Lk: jax.scipy.linalg.cho_solve((Lk, True), eye))(L)         # (K, D, D)
    logdet = 2.0 * jnp.sum(jnp.log(jnp.diagonal(L, axis1=-2, axis2=-1)), axis=-1)

    # Batch-on-lanes layout: stack components along the sublane axis.
    icov_stacked_t = inv_cov.reshape(K * D, D)             # row k*D+e = A_k[e, :]
    mu_a_t = jnp.einsum('kd,kde->ke', cen, inv_cov,
                        precision=jax.lax.Precision.HIGHEST).reshape(K * D, 1)
    cen_t = cen.reshape(K * D, 1)                          # (K*D, 1)
    const_t = (-0.5 * (D * jnp.log(2.0 * jnp.pi) + logdet)).reshape(K, 1)  # (K, 1)
    grp_t = jnp.repeat(jnp.eye(K, dtype=jnp.float32), D, axis=1)           # (K, K*D)

    return (icov_stacked_t.astype(mxu_dtype), mu_a_t, cen_t, const_t,
            grp_t.astype(mxu_dtype))


def community2emb_forward(input_labels, node_embedding, centroid, covariance_mat, pi,
                          *, tile_b=4096, num_core_splits=2,
                          mxu_dtype=jnp.bfloat16, gmm_constants=None):
    """JAX/Pallas equivalent of Community2Emb.forward (o3 loss).

    Returns a float32 array of shape (1,), matching float_tensor(1).fill_(|loss|).
    """
    if tile_b % 128 != 0:
        raise ValueError("tile_b must be a multiple of 128 (batch lives on lanes)")

    # Glue gathers, emitted already transposed (batch on the minor/lane axis).
    emb_t = node_embedding.astype(jnp.float32)[input_labels].T     # (D, B)
    pi_t = pi.astype(jnp.float32)[input_labels].T                  # (K, B)
    D, B = emb_t.shape
    K = centroid.shape[0]

    if gmm_constants is None:
        gmm_constants = precompute_gmm_constants(centroid, covariance_mat,
                                                 mxu_dtype=mxu_dtype)
    icov_t, mu_a_t, cen_t, const_t, grp_t = gmm_constants

    # Pad the batch to num_core_splits * nb * tb columns; padded columns have
    # pi == 0 so they contribute exactly 0 to the loss.
    per_split = -(-B // num_core_splits)
    tb = min(tile_b, -(-per_split // 128) * 128)
    nb = -(-per_split // tb)
    b_pad = num_core_splits * nb * tb
    if b_pad != B:
        emb_t = jnp.pad(emb_t, ((0, 0), (0, b_pad - B)))
        pi_t = jnp.pad(pi_t, ((0, 0), (0, b_pad - B)))

    grid_spec = pltpu.PrefetchScalarGridSpec(
        num_scalar_prefetch=0,
        grid=(num_core_splits, nb),
        in_specs=[
            pl.BlockSpec((D, tb), lambda c, j: (0, c * nb + j)),   # emb^T tile
            pl.BlockSpec((K, tb), lambda c, j: (0, c * nb + j)),   # pi^T tile
            pl.BlockSpec((K * D, D), lambda c, j: (0, 0)),         # stacked inv-cov
            pl.BlockSpec((K * D, 1), lambda c, j: (0, 0)),         # mu^T A
            pl.BlockSpec((K * D, 1), lambda c, j: (0, 0)),         # centroids
            pl.BlockSpec((K, 1), lambda c, j: (0, 0)),             # log-pdf consts
            pl.BlockSpec((K, K * D), lambda c, j: (0, 0)),         # group indicator
        ],
        out_specs=pl.BlockSpec((1, 1, 1), lambda c, j: (c, 0, 0)),
        scratch_shapes=[pltpu.VMEM((K, tb), jnp.float32)],
    )

    partials = pl.pallas_call(
        _community_loss_kernel,
        out_shape=jax.ShapeDtypeStruct((num_core_splits, 1, 1), jnp.float32),
        grid_spec=grid_spec,
        compiler_params=pltpu.CompilerParams(
            dimension_semantics=("parallel", "arbitrary"),
            vmem_limit_bytes=32 * 1024 * 1024),
    )(emb_t, pi_t, icov_t, mu_a_t, cen_t, const_t, grp_t)

    # abs AFTER summing the per-core partials (matches abs(float(ret_loss.sum()))).
    return jnp.abs(jnp.sum(partials)).reshape(1)


def _reference_loss(input_labels, node_embedding, centroid, covariance_mat, pi):
    """Pure-JAX f32 reference of the same forward (for correctness check)."""
    emb = node_embedding.astype(jnp.float32)[input_labels]
    pi_rows = pi.astype(jnp.float32)[input_labels]
    cov = covariance_mat.astype(jnp.float32)
    inv_cov = jnp.linalg.inv(cov)
    _, logdet = jnp.linalg.slogdet(cov)
    D = emb.shape[1]
    diff = emb[:, None, :] - centroid.astype(jnp.float32)[None, :, :]    # (B, K, D)
    quad = jnp.einsum('bkd,kde,bke->bk', diff, inv_cov, diff,
                      precision=jax.lax.Precision.HIGHEST)               # (B, K)
    logpdf = -0.5 * (D * jnp.log(2.0 * jnp.pi) + logdet)[None, :] - 0.5 * quad
    return jnp.abs(jnp.sum(logpdf * pi_rows)).reshape(1)


if __name__ == "__main__":
    # Small, deterministic synthetic setup consistent with the module:
    #   N nodes, D-dim embeddings, K GMM communities, batch of B node indices.
    N, D, K, B = 16, 32, 4, 8
    key = jax.random.PRNGKey(0)
    k_emb, k_cen, k_cov, k_pi, k_idx = jax.random.split(key, 5)

    node_embedding = 0.5 * jax.random.normal(k_emb, (N, D), dtype=jnp.float32)
    centroid = jax.random.normal(k_cen, (K, D), dtype=jnp.float32)

    # Well-conditioned SPD covariance matrices: A A^T + I
    A = 0.1 * jax.random.normal(k_cov, (K, D, D), dtype=jnp.float32)
    covariance_mat = jnp.einsum('kij,klj->kil', A, A) + jnp.eye(D, dtype=jnp.float32)

    # Mixture responsibilities per node (rows sum to 1), as predict_proba would give.
    pi = jax.nn.softmax(jax.random.normal(k_pi, (N, K), dtype=jnp.float32), axis=-1)

    input_labels = jax.random.randint(k_idx, (B,), 0, N)

    ref = jax.block_until_ready(
        _reference_loss(input_labels, node_embedding, centroid, covariance_mat, pi))

    # --- float32 MXU path: tight agreement with the f32 reference.
    out_f32 = jax.block_until_ready(
        community2emb_forward(input_labels, node_embedding, centroid,
                              covariance_mat, pi, mxu_dtype=jnp.float32))
    assert out_f32.shape == (1,) and out_f32.dtype == jnp.float32
    np.testing.assert_allclose(np.asarray(out_f32), np.asarray(ref),
                               rtol=1e-4, atol=1e-4)

    # --- bf16 MXU path (default / fast): tolerance reflects bf16 operand rounding.
    out_bf16 = jax.block_until_ready(
        community2emb_forward(input_labels, node_embedding, centroid,
                              covariance_mat, pi))
    assert out_bf16.shape == (1,) and out_bf16.dtype == jnp.float32
    np.testing.assert_allclose(np.asarray(out_bf16), np.asarray(ref),
                               rtol=2e-2, atol=1e-3)

    # --- Larger batch exercising the grid: multiple tiles per core split,
    #     padding, per-core partial accumulators, cached GMM constants.
    B2 = 1000
    labels2 = jax.random.randint(jax.random.PRNGKey(7), (B2,), 0, N)
    ref2 = jax.block_until_ready(
        _reference_loss(labels2, node_embedding, centroid, covariance_mat, pi))
    consts = precompute_gmm_constants(centroid, covariance_mat)  # cache across steps
    out2 = jax.block_until_ready(
        community2emb_forward(labels2, node_embedding, centroid, covariance_mat, pi,
                              tile_b=256, gmm_constants=consts))
    np.testing.assert_allclose(np.asarray(out2), np.asarray(ref2),
                               rtol=2e-2, atol=1e-3)

    print("KERNEL_OK")
</pallas_src>

<mosaic_0001>
module attributes {stable_mosaic.version = 11 : i64} {
  func.func @_community_loss_kernel(%arg0: i32, %arg1: i32, %arg2: memref<32x128xf32, #tpu.memory_space<vmem>>, %arg3: memref<4x128xf32, #tpu.memory_space<vmem>>, %arg4: memref<128x32xf32, #tpu.memory_space<vmem>>, %arg5: memref<128x1xf32, #tpu.memory_space<vmem>>, %arg6: memref<128x1xf32, #tpu.memory_space<vmem>>, %arg7: memref<4x1xf32, #tpu.memory_space<vmem>>, %arg8: memref<4x128xf32, #tpu.memory_space<vmem>>, %arg9: memref<1x1x1xf32, #tpu.memory_space<vmem>>, %arg10: memref<4x128xf32, #tpu.memory_space<vmem>>) attributes {dimension_semantics = [#tpu.dimension_semantics<parallel>, #tpu.dimension_semantics<arbitrary>], iteration_bounds = array<i64: 2, 1>, scalar_prefetch = 0 : i64, scratch_operands = 1 : i64, tpu.core_type = #tpu.core_type<tc>, window_params = [{transform_indices = @transform_0, window_bounds = array<i64: 32, 128>}, {transform_indices = @transform_1, window_bounds = array<i64: 4, 128>}, {pipeline_mode = #tpu.pipeline_mode<synchronous>, transform_indices = @transform_2, window_bounds = array<i64: 128, 32>}, {pipeline_mode = #tpu.pipeline_mode<synchronous>, transform_indices = @transform_3, window_bounds = array<i64: 128, 1>}, {pipeline_mode = #tpu.pipeline_mode<synchronous>, transform_indices = @transform_4, window_bounds = array<i64: 128, 1>}, {pipeline_mode = #tpu.pipeline_mode<synchronous>, transform_indices = @transform_5, window_bounds = array<i64: 4, 1>}, {pipeline_mode = #tpu.pipeline_mode<synchronous>, transform_indices = @transform_6, window_bounds = array<i64: 4, 128>}, {transform_indices = @transform_7, window_bounds = array<i64: 1, 1, 1>}]} {
    %c0_i32 = arith.constant 0 : i32
    %0 = arith.cmpi eq, %arg1, %c0_i32 : i32
    %1 = arith.extui %0 : i1 to i32
    %c0_i32_0 = arith.constant 0 : i32
    %2 = arith.cmpi ne, %1, %c0_i32_0 : i32
    scf.if %2 {
      %cst_22 = arith.constant 0.000000e+00 : f32
      %29 = vector.broadcast %cst_22 : f32 to vector<4x128xf32>
      %c0_23 = arith.constant 0 : index
      %c0_24 = arith.constant 0 : index
      %30 = vector.load %arg10[%c0_23, %c0_24] : memref<4x128xf32, #tpu.memory_space<vmem>>, vector<4x128xf32>
      tpu.vector_store %arg10[%c0_23, %c0_24], %29 {strides = array<i32>} : memref<4x128xf32, #tpu.memory_space<vmem>>, vector<4x128xf32>,
    } else {
    }
    %c0 = arith.constant 0 : index
    %c0_1 = arith.constant 0 : index
    %3 = vector.load %arg2[%c0, %c0_1] : memref<32x128xf32, #tpu.memory_space<vmem>>, vector<32x128xf32>
    %c0_2 = arith.constant 0 : index
    %c0_3 = arith.constant 0 : index
    %4 = vector.load %arg4[%c0_2, %c0_3] : memref<128x32xf32, #tpu.memory_space<vmem>>, vector<128x32xf32>
    %cst = arith.constant dense<0.000000e+00> : vector<128x128xf32>
    %5 = tpu.matmul %4, %3, %cst {dimension_numbers = #tpu.dot_dimension_numbers<[1], [0], [0], [1], [0, 0, 1, 1], [], []>} : vector<128x32xf32>, vector<32x128xf32>, vector<128x128xf32> -> vector<128x128xf32>
    %6 = tpu.concatenate %3, %3, %3, %3 in 0 : vector<32x128xf32>, vector<32x128xf32>, vector<32x128xf32>, vector<32x128xf32> -> vector<128x128xf32>
    %c0_4 = arith.constant 0 : index
    %c0_5 = arith.constant 0 : index
    %7 = vector.load %arg5[%c0_4, %c0_5] : memref<128x1xf32, #tpu.memory_space<vmem>>, vector<128x1xf32>
    %8 = vector.broadcast %7 : vector<128x1xf32> to vector<128x128xf32>
    %9 = arith.subf %5, %8 : vector<128x128xf32>
    %c0_6 = arith.constant 0 : index
    %c0_7 = arith.constant 0 : index
    %10 = vector.load %arg6[%c0_6, %c0_7] : memref<128x1xf32, #tpu.memory_space<vmem>>, vector<128x1xf32>
    %11 = vector.broadcast %10 : vector<128x1xf32> to vector<128x128xf32>
    %12 = arith.subf %6, %11 : vector<128x128xf32>
    %13 = arith.mulf %9, %12 : vector<128x128xf32>
    %c0_8 = arith.constant 0 : index
    %c0_9 = arith.constant 0 : index
    %14 = vector.load %arg8[%c0_8, %c0_9] : memref<4x128xf32, #tpu.memory_space<vmem>>, vector<4x128xf32>
    %cst_10 = arith.constant dense<0.000000e+00> : vector<4x128xf32>
    %15 = tpu.matmul %14, %13, %cst_10 {dimension_numbers = #tpu.dot_dimension_numbers<[1], [0], [0], [1], [0, 0, 1, 1], [], []>} : vector<4x128xf32>, vector<128x128xf32>, vector<4x128xf32> -> vector<4x128xf32>
    %c0_11 = arith.constant 0 : index
    %c0_12 = arith.constant 0 : index
    %16 = vector.load %arg7[%c0_11, %c0_12] : memref<4x1xf32, #tpu.memory_space<vmem>>, vector<4x1xf32>
    %cst_13 = arith.constant 5.000000e-01 : f32
    %17 = vector.broadcast %cst_13 : f32 to vector<4x128xf32>
    %18 = arith.mulf %17, %15 : vector<4x128xf32>
    %19 = vector.broadcast %16 : vector<4x1xf32> to vector<4x128xf32>
    %20 = arith.subf %19, %18 : vector<4x128xf32>
    %c0_14 = arith.constant 0 : index
    %c0_15 = arith.constant 0 : index
    %21 = vector.load %arg10[%c0_14, %c0_15] : memref<4x128xf32, #tpu.memory_space<vmem>>, vector<4x128xf32>
    %c0_16 = arith.constant 0 : index
    %c0_17 = arith.constant 0 : index
    %22 = vector.load %arg3[%c0_16, %c0_17] : memref<4x128xf32, #tpu.memory_space<vmem>>, vector<4x128xf32>
    %23 = arith.mulf %20, %22 : vector<4x128xf32>
    %24 = arith.addf %21, %23 : vector<4x128xf32>
    %c0_18 = arith.constant 0 : index
    %c0_19 = arith.constant 0 : index
    %25 = vector.load %arg10[%c0_18, %c0_19] : memref<4x128xf32, #tpu.memory_space<vmem>>, vector<4x128xf32>
    tpu.vector_store %arg10[%c0_18, %c0_19], %24 {strides = array<i32>} : memref<4x128xf32, #tpu.memory_space<vmem>>, vector<4x128xf32>,
    %c0_i32_20 = arith.constant 0 : i32
    %26 = arith.cmpi eq, %arg1, %c0_i32_20 : i32
    %27 = arith.extui %26 : i1 to i32
    %c0_i32_21 = arith.constant 0 : i32
    %28 = arith.cmpi ne, %27, %c0_i32_21 : i32
    scf.if %28 {
      %c0_22 = arith.constant 0 : index
      %c0_23 = arith.constant 0 : index
      %29 = vector.load %arg10[%c0_22, %c0_23] : memref<4x128xf32, #tpu.memory_space<vmem>>, vector<4x128xf32>
      %30 = vector.shape_cast %29 : vector<4x128xf32> to vector<1x4x128xf32>
      %cst_24 = arith.constant dense<0.000000e+00> : vector<1xf32>
      %31 = vector.multi_reduction <add>, %30, %cst_24 [1, 2] : vector<1x4x128xf32> to vector<1xf32>
      %32 = vector.shape_cast %31 : vector<1xf32> to vector<1x1x1xf32>
      %33 = vector.extract %32[0, 0, 0] : f32 from vector<1x1x1xf32>
      %34 = vector.broadcast %33 : f32 to vector<1x1xf32>
      %35 = vector.shape_cast %34 : vector<1x1xf32> to vector<1x1x1xf32>
      %c0_25 = arith.constant 0 : index
      %c0_26 = arith.constant 0 : index
      %c0_27 = arith.constant 0 : index
      %36 = vector.load %arg9[%c0_25, %c0_26, %c0_27] : memref<1x1x1xf32, #tpu.memory_space<vmem>>, vector<1x1x1xf32>
      tpu.vector_store %arg9[%c0_25, %c0_26, %c0_27], %35 {strides = array<i32>} : memref<1x1x1xf32, #tpu.memory_space<vmem>>, vector<1x1x1xf32>,
    } else {
    }
    return
  }
  func.func @transform_0(%arg0: i32, %arg1: i32) -> (i32, i32) {
    %c1_i32 = arith.constant 1 : i32
    %0 = arith.muli %arg0, %c1_i32 : i32
    %1 = arith.addi %0, %arg1 : i32
    %c0_i32 = arith.constant 0 : i32
    %c0_i32_0 = arith.constant 0 : i32
    return %c0_i32, %1 : i32, i32
  }
  func.func @transform_1(%arg0: i32, %arg1: i32) -> (i32, i32) {
    %c1_i32 = arith.constant 1 : i32
    %0 = arith.muli %arg0, %c1_i32 : i32
    %1 = arith.addi %0, %arg1 : i32
    %c0_i32 = arith.constant 0 : i32
    %c0_i32_0 = arith.constant 0 : i32
    return %c0_i32, %1 : i32, i32
  }
  func.func @transform_2(%arg0: i32, %arg1: i32) -> (i32, i32) {
    %c0_i32 = arith.constant 0 : i32
    %c0_i32_0 = arith.constant 0 : i32
    %c0_i32_1 = arith.constant 0 : i32
    return %c0_i32, %c0_i32_0 : i32, i32
  }
  func.func @transform_3(%arg0: i32, %arg1: i32) -> (i32, i32) {
    %c0_i32 = arith.constant 0 : i32
    %c0_i32_0 = arith.constant 0 : i32
    %c0_i32_1 = arith.constant 0 : i32
    return %c0_i32, %c0_i32_0 : i32, i32
  }
  func.func @transform_4(%arg0: i32, %arg1: i32) -> (i32, i32) {
    %c0_i32 = arith.constant 0 : i32
    %c0_i32_0 = arith.constant 0 : i32
    %c0_i32_1 = arith.constant 0 : i32
    return %c0_i32, %c0_i32_0 : i32, i32
  }
  func.func @transform_5(%arg0: i32, %arg1: i32) -> (i32, i32) {
    %c0_i32 = arith.constant 0 : i32
    %c0_i32_0 = arith.constant 0 : i32
    %c0_i32_1 = arith.constant 0 : i32
    return %c0_i32, %c0_i32_0 : i32, i32
  }
  func.func @transform_6(%arg0: i32, %arg1: i32) -> (i32, i32) {
    %c0_i32 = arith.constant 0 : i32
    %c0_i32_0 = arith.constant 0 : i32
    %c0_i32_1 = arith.constant 0 : i32
    return %c0_i32, %c0_i32_0 : i32, i32
  }
  func.func @transform_7(%arg0: i32, %arg1: i32) -> (i32, i32, i32) {
    %c0_i32 = arith.constant 0 : i32
    %c0_i32_0 = arith.constant 0 : i32
    %c0_i32_1 = arith.constant 0 : i32
    return %arg0, %c0_i32, %c0_i32_0 : i32, i32, i32
  }
}

</mosaic_0001>

<bundles_post_ra>
// kernel: tpu_custom_call.1
= control target key start
LH: loop header
LB: loop body
LE: loop exit
PB: predicated region body
PF: predicated region fallthrough
CT: control target
= control target key end

     0   :  { %s1258_s24 = smov 0   ;;  %s1260_s25 = smov 0   ;;  %s1598_s0 = inlined_call_operand.vmem [shape: f32[32,256], index: 0, kind: input, shape index: {}]   ;;  %s1599_s1 = inlined_call_operand.vmem [shape: f32[4,256], index: 1, kind: input, shape index: {}]   ;;  %s1600_s2 = inlined_call_operand.vmem [shape: f32[128,32], index: 2, kind: input, shape index: {}]   ;;  %s1601_s3 = inlined_call_operand.vmem [shape: f32[128,1], index: 3, kind: input, shape index: {}]   ;;  %s1602_s4 = inlined_call_operand.vmem [shape: f32[128,1], index: 4, kind: input, shape index: {}]   ;;  %s1603_s5 = inlined_call_operand.vmem [shape: f32[4,1], index: 5, kind: input, shape index: {}]   ;;  %s1604_s6 = inlined_call_operand.vmem [shape: f32[4,128], index: 6, kind: input, shape index: {}]   ;;  %s1605_s7 = inlined_call_operand.vmem [shape: f32[2,1,1], index: 7, kind: output, shape index: {}]  }
   0x1   :  { %s1262_s26 = smov 0   ;;  %s1264_s27 = smov 0  }
   0x2   :  { %s1266_s28 = smov 0  }
   0x3 LB: > { %s29_s29 = sadd.s32 1, %s1209_s27  ;;  %p45_p1 = scmp.ne.s32.totalorder %s1201_s25, %s1197_s24  ;;  %s1213_s28 = sphi %s1266_s28, %s17_s28   ;;  %s1209_s27 = sphi %s1264_s27, %s1609_s27   ;;  %s1205_s26 = sphi %s1262_s26, %s1608_s26   ;;  %s1201_s25 = sphi %s1260_s25, %s1607_s25   ;;  %s1197_s24 = sphi %s1258_s24, %s1606_s24  }
   0x4   : > { %p31_p0 = scmp.ge.s32.totalorder %s29_s29, 2  ;;  %p46_p2 = scmp.eq.s32.totalorder %s1213_s28, 0 }
   0x5   : > { %s38_s8 = sadd.s32 1, %s1201_s25  ;;  %p1000_p5 = scmp.ge.s32.totalorder %s1213_s28, 2 }
   0x6   : > { %s1611_s29 = smov (%p31_p0, %s29_s29), 0  ;;  %p47_p3 = por %p46_p2, %p45_p1 }
   0x7   : > { %s35_s30 = ssub.s32 %s1209_s27, %s1611_s29  ;;  %245 = sbr.rel (%p1000_p5) target bundleno = 18 (0x12), region = 36 }
   0x8   : > { %p36_p4 = scmp.eq.s32.totalorder %s35_s30, 0 }
   0xa   : > { %s1293_s9 = scalar_select %p36_p4, %s1201_s25, %s38_s8  }
   0xc   : > { %248 = sbr.rel (!%p47_p3) target bundleno = 18 (0x12), region = 40  ;;  %s250_s10 = sand.u32 (%p47_p3), 1, %s1201_s25  }
   0xd   : > { %s1002_s11 = sshll.u32 (%p47_p3), %s1209_s27, 3  ;;  %s1001_s12 = sshll.u32 (%p47_p3), %s250_s10, 5 }
   0xe   : > { %s255_s15 = scalar_lea.vmem (%p47_p3), %s1598_s0, %s1002_s11  ;;  %s252_s16 = scalar_lea.vmem (%p47_p3), [#allocation3], %s1001_s12 }
   0xf   : > { %v290_v0 = vld [vmem:[%s255_s15] sm:$0xff] (%p47_p3)  ;;  %v292_v1 = vld [vmem:[%s255_s15 + $0x10] sm:$0xff] (%p47_p3) }
  0x10   : > { %v294_v2 = vld [vmem:[%s255_s15 + $0x20] sm:$0xff] (%p47_p3)  ;;  %291 = vst [vmem:[%s252_s16] sm:$0xff] (%p47_p3), %v290_v0  ;;  %293 = vst [vmem:[%s252_s16 + $0x8] sm:$0xff] (%p47_p3), %v292_v1  ;;  %v296_v3 = vld [vmem:[%s255_s15 + $0x30] sm:$0xff] (%p47_p3) }
  0x11   : > { %295 = vst [vmem:[%s252_s16 + $0x10] sm:$0xff] %v294_v2  ;;  %297 = vst [vmem:[%s252_s16 + $0x18] sm:$0xff] %v296_v3 }
  0x12 PF: > { %p1003_p6 = scmp.ge.s32.totalorder %s1213_s28, 1  ;;  %p311_p7 = scmp.lt.s32.totalorder %s1213_s28, 3 }
  0x14   : > { %p312_p8 = pnand %p1003_p6, %p311_p7 }
  0x15   : > { %s318_s17 = sand.u32 (!%p312_p8), 1, %s1197_s24   ;;  %p354_p9 = scmp.lt.s32.totalorder (!%p312_p8), %s1205_s26, 1 }
  0x16   : > { %315 = sbr.rel (%p312_p8) target bundleno = 706 (0x2c2), region = 82  ;;  %s1004_s22 = sshll.u32 (!%p312_p8), %s318_s17, 5 }
  0x17   : > { %s320_s24 = scalar_lea.vmem (!%p312_p8), [#allocation3], %s1004_s22 }
  0x1b   : > { %v371_v4 = vld [vmem:[%s1600_s2] sm:$0xff]  ;;  %vm387_vm0 = vcmask 261120   ;;  %v596_v5 = vld [vmem:[%s1601_s3 + $0x78] sm:$0xff]  ;;  %v1215_v6 = vmov 0   ;;  %v595_v7 = vld [vmem:[%s1601_s3 + $0x70] sm:$0xff]  ;;  %v1216_v58 = vmov 0.0  }
  0x1c   : > { %1069 = vmatprep.mubr.msk.f32.mxu0 %vm387_vm0, %v371_v4  ;;  %1173 = vset.pattern.permute.xlu0 %v1215_v6  ;;  %v1314_v8 = vld [vmem:[%s320_s24 + $0x18] sm:$0xff]  ;;  %v1316_v9 = vld [vmem:[%s320_s24 + $0x10] sm:$0xff]  ;;  %v1326_v12 = vld [vmem:[%s320_s24 + $0x8] sm:$0xff]  ;;  %366 = vst [vmem:[#allocation2] sm:$0xf] %v1216_v58  ;;  %vm1217_vm1 = vmmov 0  }
  0x1d   : > { %674 = vperm.xlu0 %1173, %v596_v5   ;;  %1174 = vset.pattern.permute.xlu1 %v1215_v6  ;;  %v708_v10 = vld [vmem:[%s1602_s4 + $0x78] sm:$0xff]  ;;  %v707_v11 = vld [vmem:[%s1602_s4 + $0x70] sm:$0xff]  ;;  %v1330_v13 = vld [vmem:[%s320_s24] sm:$0xff]  ;;  %s1613_s26 = smov (!%p354_p9, %s1205_s26), 1  ;;  %vm909_vm2 = vcmask 1043456   ;;  %vm921_vm3 = vcmask 0  }
  0x1e   : > { %669 = vperm.xlu1 %1174, %v595_v7   ;;  %1061 = vmatprep.subr.mxu0 %v1314_v8  ;;  %v594_v14 = vld [vmem:[%s1601_s3 + $0x68] sm:$0xff]  ;;  %v373_v17 = vld [vmem:[%s1600_s2 + $0x10] sm:$0xff]  ;;  %v593_v18 = vld [vmem:[%s1601_s3 + $0x60] sm:$0xff]  ;;  %s1005_s18 = sshll.u32 %s1613_s26, 2  ;;  %s361_s30 = scalar_lea.vmem %s1605_s7, %s1613_s26 }
  0x1f   : > { %1062 = vmatpush3.msra.mxu0 %v1314_v8  ;;  %v706_v15 = vld [vmem:[%s1602_s4 + $0x68] sm:$0xff]  ;;  %v705_v19 = vld [vmem:[%s1602_s4 + $0x60] sm:$0xff]  ;;  %v374_v20 = vld [vmem:[%s1600_s2 + $0x18] sm:$0xff]  ;;  %1093 = vmatprep.subr.mxu1 %v1216_v58  ;;  %s357_s21 = scalar_lea.vmem %s1599_s1, %s1005_s18 }
  0x20   : > { %1063 = vmatprep.subr.mxu0 %v1316_v9  ;;  %v372_v16 = vld [vmem:[%s1600_s2 + $0x8] sm:$0xff]  ;;  %v375_v21 = vld [vmem:[%s1600_s2 + $0x20] sm:$0xff]  ;;  %v592_v22 = vld [vmem:[%s1601_s3 + $0x58] sm:$0xff]  ;;  %1125 = vmatprep.mubr.msk.f32.mxu1 %vm1217_vm1, %v1216_v58 }
  0x21   : > { %786 = vperm.xlu0 %1173, %v708_v10   ;;  %1064 = vmatpush3.msra.mxu0 %v1316_v9  ;;  %v704_v23 = vld [vmem:[%s1602_s4 + $0x58] sm:$0xff]  ;;  %v376_v24 = vld [vmem:[%s1600_s2 + $0x28] sm:$0xff]  ;;  %v377_v25 = vld [vmem:[%s1600_s2 + $0x30] sm:$0xff] }
  0x22   : > { %781 = vperm.xlu1 %1174, %v707_v11   ;;  %1065 = vmatprep.subr.mxu0 %v1326_v12  ;;  %v591_v26 = vld [vmem:[%s1601_s3 + $0x50] sm:$0xff]  ;;  %v378_v28 = vld [vmem:[%s1600_s2 + $0x38] sm:$0xff]  ;;  %v379_v29 = vld [vmem:[%s1600_s2 + $0x40] sm:$0xff] }
  0x23   : > { %1066 = vmatpush3.msra.mxu0 %v1326_v12  ;;  %v703_v27 = vld [vmem:[%s1602_s4 + $0x50] sm:$0xff]  ;;  %v590_v30 = vld [vmem:[%s1601_s3 + $0x48] sm:$0xff]  ;;  %v589_v34 = vld [vmem:[%s1601_s3 + $0x40] sm:$0xff] }
  0x24   : > { %1067 = vmatprep.subr.mxu0 %v1330_v13  ;;  %v702_v31 = vld [vmem:[%s1602_s4 + $0x48] sm:$0xff]  ;;  %v381_v33 = vld [vmem:[%s1600_s2 + $0x50] sm:$0xff]  ;;  %v701_v35 = vld [vmem:[%s1602_s4 + $0x40] sm:$0xff] }
  0x25   : > { %664 = vperm.xlu0 %1173, %v594_v14   ;;  %1068 = vmatpush3.msra.mxu0 %v1330_v13  ;;  %v380_v32 = vld [vmem:[%s1600_s2 + $0x48] sm:$0xff]  ;;  %v382_v36 = vld [vmem:[%s1600_s2 + $0x58] sm:$0xff]  ;;  %v383_v37 = vld [vmem:[%s1600_s2 + $0x60] sm:$0xff] }
  0x26   : > { %776 = vperm.xlu1 %1174, %v706_v15   ;;  %1070 = vmatmul.mubr.msk.f32.vlgmr.msra.gmra.mxu0 %vm387_vm0, %v372_v16  ;;  %v588_v38 = vld [vmem:[%s1601_s3 + $0x38] sm:$0xff]  ;;  %v384_v40 = vld [vmem:[%s1600_s2 + $0x68] sm:$0xff]  ;;  %v385_v41 = vld [vmem:[%s1600_s2 + $0x70] sm:$0xff] }
  0x27   : > { %1072 = vmatprep.mubr.msk.f32.mxu0 %vm387_vm0, %v373_v17  ;;  %v700_v39 = vld [vmem:[%s1602_s4 + $0x38] sm:$0xff]  ;;  %v587_v42 = vld [vmem:[%s1601_s3 + $0x30] sm:$0xff]  ;;  %v586_v45 = vld [vmem:[%s1601_s3 + $0x28] sm:$0xff] }
  0x28   : > { %v699_v43 = vld [vmem:[%s1602_s4 + $0x30] sm:$0xff]  ;;  %v386_v44 = vld [vmem:[%s1600_s2 + $0x78] sm:$0xff]  ;;  %v698_v46 = vld [vmem:[%s1602_s4 + $0x28] sm:$0xff] }
  0x29   : > { %659 = vperm.xlu0 %1173, %v593_v18   ;;  %v585_v47 = vld [vmem:[%s1601_s3 + $0x20] sm:$0xff]  ;;  %v584_v49 = vld [vmem:[%s1601_s3 + $0x18] sm:$0xff]  ;;  %v583_v51 = vld [vmem:[%s1601_s3 + $0x10] sm:$0xff] }
  0x2a   : > { %771 = vperm.xlu1 %1174, %v705_v19   ;;  %1073 = vmatmul.mubr.msk.f32.gmra.mxu0 %vm387_vm0, %v374_v20  ;;  %v697_v48 = vld [vmem:[%s1602_s4 + $0x20] sm:$0xff]  ;;  %v696_v50 = vld [vmem:[%s1602_s4 + $0x18] sm:$0xff]  ;;  %v695_v52 = vld [vmem:[%s1602_s4 + $0x10] sm:$0xff] }
  0x2b   : > { %1075 = vmatprep.mubr.msk.f32.mxu0 %vm387_vm0, %v375_v21  ;;  %v582_v53 = vld [vmem:[%s1601_s3 + $0x8] sm:$0xff]  ;;  %v581_v55 = vld [vmem:[%s1601_s3] sm:$0xff] }
  0x2c   : > { %v694_v54 = vld [vmem:[%s1602_s4 + $0x8] sm:$0xff]  ;;  %v693_v56 = vld [vmem:[%s1602_s4] sm:$0xff] }
  0x2d   : > { %654 = vperm.xlu0 %1173, %v592_v22   ;;  %v892_v57 = vld [vmem:[%s1603_s5] sm:$0xf] }
  0x2e   : > { %766 = vperm.xlu1 %1174, %v704_v23   ;;  %1076 = vmatmul.mubr.msk.f32.gmra.mxu0 %vm387_vm0, %v376_v24 }
  0x2f   : > { %1078 = vmatprep.mubr.msk.f32.mxu0 %vm387_vm0, %v377_v25 }
  0x31   : > { %649 = vperm.xlu0 %1173, %v591_v26  }
  0x32   : > { %761 = vperm.xlu1 %1174, %v703_v27   ;;  %1079 = vmatmul.mubr.msk.f32.gmra.mxu0 %vm387_vm0, %v378_v28 }
  0x33   : > { %1081 = vmatprep.mubr.msk.f32.mxu0 %vm387_vm0, %v379_v29 }
  0x35   : > { %644 = vperm.xlu0 %1173, %v590_v30  }
  0x36   : > { %756 = vperm.xlu1 %1174, %v702_v31   ;;  %1082 = vmatmul.mubr.msk.f32.gmra.mxu0 %vm387_vm0, %v380_v32 }
  0x37   : > { %1084 = vmatprep.mubr.msk.f32.mxu0 %vm387_vm0, %v381_v33 }
  0x39   : > { %639 = vperm.xlu0 %1173, %v589_v34  }
  0x3a   : > { %751 = vperm.xlu1 %1174, %v701_v35   ;;  %1085 = vmatmul.mubr.msk.f32.gmra.mxu0 %vm387_vm0, %v382_v36 }
  0x3b   : > { %1087 = vmatprep.mubr.msk.f32.mxu0 %vm387_vm0, %v383_v37 }
  0x3d   : > { %634 = vperm.xlu0 %1173, %v588_v38  }
  0x3e   : > { %746 = vperm.xlu1 %1174, %v700_v39   ;;  %1088 = vmatmul.mubr.msk.f32.gmra.mxu0 %vm387_vm0, %v384_v40 }
  0x3f   : > { %1090 = vmatprep.mubr.msk.f32.mxu0 %vm387_vm0, %v385_v41 }
  0x41   : > { %629 = vperm.xlu0 %1173, %v587_v42  }
  0x42   : > { %741 = vperm.xlu1 %1174, %v699_v43   ;;  %1091 = vmatmul.mubr.msk.f32.gmra.mxu0 %vm387_vm0, %v386_v44 }
  0x45   : > { %624 = vperm.xlu0 %1173, %v586_v45  }
  0x46   : > { %736 = vperm.xlu1 %1174, %v698_v46  }
  0x49   : > { %619 = vperm.xlu0 %1173, %v585_v47  }
  0x4a   : > { %731 = vperm.xlu1 %1174, %v697_v48  }
  0x4d   : > { %614 = vperm.xlu0 %1173, %v584_v49  }
  0x4e   : > { %726 = vperm.xlu1 %1174, %v696_v50  }
  0x51   : > { %609 = vperm.xlu0 %1173, %v583_v51  }
  0x52   : > { %721 = vperm.xlu1 %1174, %v695_v52  }
  0x55   : > { %604 = vperm.xlu0 %1173, %v582_v53  }
  0x56   : > { %716 = vperm.xlu1 %1174, %v694_v54  }
  0x59   : > { %599 = vperm.xlu0 %1173, %v581_v55  }
  0x5a   : > { %711 = vperm.xlu1 %1174, %v693_v56  }
  0x5d   : > { %896 = vperm.xlu0 %1173, %v892_v57  }
  0x98   : > { %v675_v59 = vpop.permute.xlu0 %674 }
  0x99   : > { %v670_v60 = vpop.permute.xlu1 %669 }
  0x9c   : > { %v787_v61 = vpop.permute.xlu0 %786 }
  0x9d   : > { %v782_v62 = vpop.permute.xlu1 %781  ;;  %v804_v36 = vsub.f32 %v1314_v8, %v787_v61 }
  0x9e   : > { %v803_v39 = vsub.f32 %v1316_v9, %v782_v62 }
  0xa0   : > { %v665_v63 = vpop.permute.xlu0 %664 }
  0xa1   : > { %v777_v0 = vpop.permute.xlu1 %776 }
  0xa2   : > { %v802_v45 = vsub.f32 %v1326_v12, %v777_v0 }
  0xa4   : > { %v660_v1 = vpop.permute.xlu0 %659 }
  0xa5   : > { %v772_v2 = vpop.permute.xlu1 %771 }
  0xa6   : > { %v801_v48 = vsub.f32 %v1330_v13, %v772_v2 }
  0xa8   : > { %v655_v3 = vpop.permute.xlu0 %654 }
  0xa9   : > { %v767_v4 = vpop.permute.xlu1 %766 }
  0xaa   : > { %v800_v51 = vsub.f32 %v1314_v8, %v767_v4 }
  0xac   : > { %v650_v5 = vpop.permute.xlu0 %649 }
  0xad   : > { %v762_v6 = vpop.permute.xlu1 %761 }
  0xae   : > { %v799_v56 = vsub.f32 %v1316_v9, %v762_v6 }
  0xb0   : > { %v1488_v10 = vpop.permute.xlu0 %644 }
  0xb1   : > { %v757_v11 = vpop.permute.xlu1 %756 }
  0xb4   : > { %v1496_v17 = vpop.permute.xlu0 %639 }
  0xb5   : > { %v1498_v18 = vpop.permute.xlu1 %751 }
  0xb8   : > { %v1506_v22 = vpop.permute.xlu0 %634 }
  0xb9   : > { %v1508_v23 = vpop.permute.xlu1 %746 }
  0xba   : > { %v796_v4 = vsub.f32 %v1314_v8, %v1508_v23 }
  0xbc   : > { %v1512_v27 = vpop.permute.xlu0 %629 }
  0xbd   : > { %v1514_v28 = vpop.permute.xlu1 %741 }
  0xc0   : > { %v1516_v32 = vpop.permute.xlu0 %624 }
  0xc1   : > { %v1518_v33 = vpop.permute.xlu1 %736 }
  0xc4   : > { %v620_v43 = vpop.permute.xlu0 %619 }
  0xc5   : > { %v732_v44 = vpop.permute.xlu1 %731 }
  0xc8   : > { %v615_v54 = vpop.permute.xlu0 %614 }
  0xc9   : > { %v727_v55 = vpop.permute.xlu1 %726 }
  0xcc   : > { %v610_v2 = vpop.permute.xlu0 %609 }
  0xd0   : > { %v605_v23 = vpop.permute.xlu0 %604 }
  0xe6   : > { %v1486_v7 = vpop.f32.mrf.mxu0 }
  0xe8   : > { %v1490_v14 = vpop.f32.mrf.mxu0 }
  0xea   : > { %v1492_v15 = vpop.f32.mrf.mxu0 }
  0xec   : > { %v1494_v16 = vpop.f32.mrf.mxu0 }
  0xee   : > { %v1500_v19 = vpop.f32.mrf.mxu0 }
  0xf0   : > { %v1502_v20 = vpop.f32.mrf.mxu0 }
  0xf2   : > { %v1504_v21 = vpop.f32.mrf.mxu0 }
  0xf3   : > { %v684_v0 = vsub.f32 %v1504_v21, %v1506_v22  ;;  %v681_v21 = vsub.f32 %v1502_v20, %v620_v43 }
  0xf4   : > { %v1510_v24 = vpop.f32.mrf.mxu0 }
  0xf6   : > { %v1083_v25 = vpop.f32.mrf.mxu0 }
  0xf7   : > { %v686_v57 = vsub.f32 %v1083_v25, %v1488_v10  ;;  %v795_v10 = vsub.f32 %v1316_v9, %v1514_v28  ;;  %v793_v25 = vsub.f32 %v1330_v13, %v732_v44  ;;  %v679_v28 = vsub.f32 %v1494_v16, %v610_v2 }
  0xf8   : > { %v542_v26 = vpop.f32.mrf.mxu0 }
  0xf9   : > { %v685_v61 = vsub.f32 %v542_v26, %v1496_v17  ;;  %v812_v17 = vmul.f32 %v796_v4, %v684_v0  ;;  %v680_v26 = vsub.f32 %v1492_v15, %v615_v54 }
  0xfa   : > { %v1086_v29 = vpop.f32.mrf.mxu0 }
  0xfb   : > { %v688_v49 = vsub.f32 %v1086_v29, %v655_v3  ;;  %v722_v3 = vpop.permute.xlu1 %721  ;;  %v809_v29 = vmul.f32 %v793_v25, %v681_v21 }
  0xfc   : > { %v552_v30 = vpop.f32.mrf.mxu0  ;;  %v791_v20 = vsub.f32 %v1316_v9, %v722_v3 }
  0xfd   : > { %v687_v52 = vsub.f32 %v552_v30, %v650_v5  ;;  %v683_v5 = vsub.f32 %v1510_v24, %v1512_v27  ;;  %v792_v27 = vsub.f32 %v1314_v8, %v727_v55  ;;  %v678_v30 = vsub.f32 %v1486_v7, %v605_v23 }
  0xfe   : > { %v1089_v31 = vpop.f32.mrf.mxu0  ;;  %v807_v16 = vmul.f32 %v791_v20, %v679_v28 }
  0xff   : > { %v690_v40 = vsub.f32 %v1089_v31, %v665_v63  ;;  %v815_v62 = vmul.f32 %v799_v56, %v687_v52  ;;  %v797_v63 = vsub.f32 %v1330_v13, %v1498_v18  ;;  %v794_v18 = vsub.f32 %v1326_v12, %v1518_v33  ;;  %v717_v24 = vpop.permute.xlu1 %716 }
 0x100   : > { %v562_v34 = vpop.f32.mrf.mxu0  ;;  %v811_v22 = vmul.f32 %v795_v10, %v683_v5  ;;  %v808_v31 = vmul.f32 %v792_v27, %v680_v26  ;;  %v790_v33 = vsub.f32 %v1326_v12, %v717_v24 }
 0x101   : > { %v689_v46 = vsub.f32 %v562_v34, %v660_v1  ;;  %v818_v50 = vmul.f32 %v802_v45, %v690_v40  ;;  %v813_v6 = vmul.f32 %v797_v63, %v685_v61 }
 0x102   : > { %v1092_v35 = vpop.f32.mrf.mxu0  ;;  %v806_v34 = vmul.f32 %v790_v33, %v678_v30 }
 0x103   : > { %v692_v37 = vsub.f32 %v1092_v35, %v675_v59  ;;  %v817_v53 = vmul.f32 %v801_v48, %v689_v46  ;;  %v816_v59 = vmul.f32 %v800_v51, %v688_v49  ;;  %v712_v15 = vpop.permute.xlu1 %711  ;;  %v821_v35 = vld [vmem:[%s1604_s6] sm:$0xf] }
 0x104   : > { %v572_v38 = vpop.f32.mrf.mxu0  ;;  %v789_v9 = vsub.f32 %v1330_v13, %v712_v15 }
 0x105   : > { %v691_v41 = vsub.f32 %v572_v38, %v670_v60  ;;  %v820_v42 = vmul.f32 %v804_v36, %v692_v37  ;;  %v798_v60 = vsub.f32 %v1326_v12, %v757_v11  ;;  %v682_v11 = vsub.f32 %v1500_v19, %v1516_v32  ;;  %v600_v32 = vpop.permute.xlu0 %599  ;;  %v901_v36 = vld [vmem:[%s357_s21] sm:$0xf] }
 0x106   : > { %v677_v8 = vsub.f32 %v1490_v14, %v600_v32 }
 0x107   : > { %v819_v47 = vmul.f32 %v803_v39, %v691_v41  ;;  %1094 = vmatpush3.msra.mxu1 %v820_v42  ;;  %v814_v1 = vmul.f32 %v798_v60, %v686_v57  ;;  %v810_v19 = vmul.f32 %v794_v18, %v682_v11  ;;  %v900_v39 = vld [vmem:[#allocation2] sm:$0xf] }
 0x108   : > { %1095 = vmatprep.subr.mxu1 %v1216_v58  ;;  %v805_v7 = vmul.f32 %v789_v9, %v677_v8 }
 0x109   : > { %1096 = vmatpush3.msra.mxu1 %v819_v47  ;;  %v897_v14 = vpop.permute.xlu0 %896 }
 0x10a   : > { %1097 = vmatprep.subr.mxu1 %v1216_v58 }
 0x10b   : > { %1098 = vmatpush3.msra.mxu1 %v818_v50 }
 0x10c   : > { %1099 = vmatprep.subr.mxu1 %v1216_v58 }
 0x10d   : > { %1100 = vmatpush3.msra.mxu1 %v817_v53 }
 0x10e   : > { %1101 = vmatprep.subr.mxu1 %v1216_v58 }
 0x10f   : > { %1102 = vmatpush3.msra.mxu1 %v816_v59 }
 0x110   : > { %1103 = vmatprep.subr.mxu1 %v1216_v58 }
 0x111   : > { %1104 = vmatpush3.msra.mxu1 %v815_v62 }
 0x112   : > { %1105 = vmatprep.subr.mxu1 %v1216_v58 }
 0x113   : > { %1106 = vmatpush3.msra.mxu1 %v814_v1 }
 0x114   : > { %1107 = vmatprep.subr.mxu1 %v1216_v58 }
 0x115   : > { %1108 = vmatpush3.msra.mxu1 %v813_v6 }
 0x116   : > { %1109 = vmatprep.subr.mxu1 %v1216_v58 }
 0x117   : > { %1110 = vmatpush3.msra.mxu1 %v812_v17 }
 0x118   : > { %1111 = vmatprep.subr.mxu1 %v1216_v58 }
 0x119   : > { %1112 = vmatpush3.msra.mxu1 %v811_v22 }
 0x11a   : > { %1113 = vmatprep.subr.mxu1 %v1216_v58 }
 0x11b   : > { %1114 = vmatpush3.msra.mxu1 %v810_v19 }
 0x11c   : > { %1115 = vmatprep.subr.mxu1 %v1216_v58 }
 0x11d   : > { %1116 = vmatpush3.msra.mxu1 %v809_v29 }
 0x11e   : > { %1117 = vmatprep.subr.mxu1 %v1216_v58 }
 0x11f   : > { %1118 = vmatpush3.msra.mxu1 %v808_v31 }
 0x120   : > { %1119 = vmatprep.subr.mxu1 %v1216_v58 }
 0x121   : > { %1120 = vmatpush3.msra.mxu1 %v807_v16 }
 0x122   : > { %1121 = vmatprep.subr.mxu1 %v1216_v58 }
 0x123   : > { %1122 = vmatpush3.msra.mxu1 %v806_v34 }
 0x124   : > { %1123 = vmatprep.subr.mxu1 %v1216_v58 }
 0x125   : > { %1124 = vmatpush3.msra.mxu1 %v805_v7 }
 0x126   : > { %1126 = vmatmul.mubr.f32.vlgmr.msra.gmra.mxu1 %v821_v35 }
 0x1e6   : > { %v888_v12 = vpop.f32.mrf.mxu1 }
 0x1e7   : > { %v893_v13 = vmul.f32 0.5, %v888_v12 }
 0x1e8   : > { %v1127_v37 = vpop.f32.mrf.mxu1 }
 0x1e9   : > { %v899_v38 = vsub.f32 %v897_v14, %v893_v13 }
 0x1eb   : > { %v902_v58 = vmul.f32 %v901_v36, %v899_v38 }
 0x1ed   : > { %v903_v40 = vadd.f32 %v902_v58, %v900_v39 }
 0x1ef   : > { %904 = vst [vmem:[#allocation2] sm:$0xf] %v903_v40 }
 0x1f6   : > { %v908_v41 = vld [vmem:[#allocation2] sm:$0xf] }
 0x1f7   : > { %v910_v42 = vsel %vm909_vm2, %v908_v41, 0.0 }
 0x1f8   : > { %911 = vadd.xlane.f32.xlu1 %v910_v42 }
 0x281   : > { %v912_v43 = vpop.xlane.xlu1 %911 }
 0x282   : > { %v913_v44 = vrot.slane %v912_v43, 4 }
 0x284   : > { %v914_v45 = vadd.f32 %v913_v44, %v912_v43 }
 0x286   : > { %v915_v46 = vrot.slane %v914_v45, 2 }
 0x288   : > { %v916_v47 = vadd.f32 %v915_v46, %v914_v45 }
 0x28a   : > { %v917_v48 = vrot.slane %v916_v47, 1 }
 0x28c   : > { %v918_v49 = vadd.f32 %v917_v48, %v916_v47 }
 0x28e   : > { %1128 = vpush %v918_v49 }
 0x2bf   : > { %s1129_s24 = spop %1128 }
 0x2c0   : > { %v920_v50 = vstv %s1129_s24 }
 0x2c1   : > { %922 = vst.msk [vmem:[%s361_s30] sm:$0x1] %vm921_vm3, %v920_v50 }
 0x2c2 PF: > { %s17_s28 = sadd.s32 1, %s1213_s28   ;;  %s1606_s24 = smov %s1201_s25 }
 0x2c3   : > { %p14_p10 = scmp.ge.s32.totalorder %s17_s28, 4   ;;  %s1607_s25 = smov %s1293_s9 }
 0x2c4   : > { %s1608_s26 = smov %s1209_s27  ;;  %s1609_s27 = smov %s1611_s29 }
 0x2c5   :  { %16 = sbr.rel (!%p14_p10) target bundleno = 3 (0x3), region = 132 }

</bundles_post_ra>
